<compile_context>
chip_gen: v5e
topology: v5e:2x2
jax: 0.10.0
libtpu: 0.0.40
codegen_flags: <defaults>
</compile_context>

<pallas_src>
import jax
import jax.numpy as jnp
from jax.experimental import pallas as pl
from jax.experimental.pallas import tpu as pltpu


def _round_up(x, m):
    return -(-x // m) * m


def _sublane(dtype):
    it = jnp.dtype(dtype).itemsize
    return max(8, 32 // max(it, 1))        # 8 for 32-bit, 16 for bf16, 32 for int8/fp8


def _block_vmem_bytes(rows, cols, dtype):
    """(8,128)-padded VMEM bytes of a (rows, cols) block (sub-32-bit dtypes pack sublanes)."""
    it = jnp.dtype(dtype).itemsize
    return _round_up(max(rows, 1), _sublane(dtype)) * _round_up(max(cols, 1), 128) * it


def _choose_block_b(B, PS, S, pred_dtype, tgt_dtype, vmem_budget_bytes):
    if B <= 8:
        return B                            # single full-extent block (valid block shape)
    # Double-buffered, (8,128)-padded bytes per 8 batch rows (predictions dominate).
    per8 = 2 * (_block_vmem_bytes(8, PS, pred_dtype)
                + _block_vmem_bytes(8, S, tgt_dtype)
                + _block_vmem_bytes(8, 1, jnp.int32)
                + _block_vmem_bytes(8, 1, jnp.float32))
    by_vmem = max(1, vmem_budget_bytes // per8) * 8
    by_batch = (B // 8) * 8                                   # <= B, multiple of 8
    by_parallel = max(8, ((-(-B // 4)) // 8) * 8)             # keep >= ~4 grid steps (megacore)
    return max(8, min(by_vmem, by_batch, by_parallel))


def _wmse_kernel(gl_ref, pred_ref, tgt_ref, out_ref):
    """gl_ref: (Bt,1) i32 in [1,S]; pred_ref: (Bt, P*S); tgt_ref: (Bt, S); out_ref: (Bt,1) f32."""
    bt, ps = pred_ref.shape
    s = tgt_ref.shape[-1]
    p = ps // s

    gl = gl_ref[...]                                              # (Bt, 1) int32
    glf = gl.astype(jnp.float32)

    # w[b, s] = (s+1)/L_b for s < L_b else 0; built once per block, reciprocal-multiply.
    pos = jax.lax.broadcasted_iota(jnp.int32, (1, s), 1)          # (1, S)
    inv_l = pl.reciprocal(glf, approx=False)                      # (Bt, 1)
    w = jnp.where(pos < gl,
                  (pos + 1).astype(jnp.float32) * inv_l,
                  jnp.float32(0.0))                               # (Bt, S)

    tgt = tgt_ref[...].astype(jnp.float32)                        # (Bt, S)

    # Weights/targets do not depend on the prediction index p: walk the P static lane-slices of
    # the flattened predictions block (unrolled; lane-only ops, no cross-sublane reduce).
    num = jnp.zeros((bt, 1), jnp.float32)
    for pi in range(p):
        d = pred_ref[:, pi * s:(pi + 1) * s].astype(jnp.float32) - tgt     # (Bt, S)
        num = num + jnp.sum(d * d * w, axis=1, keepdims=True)              # (Bt, 1)

    # Closed-form denominator: sum_s w[b, s] = (L_b + 1)/2  ->  scale by 2/(L_b + 1).
    scale = 2.0 * pl.reciprocal(glf + 1.0, approx=False)          # (Bt, 1)
    out_ref[...] = num * scale                                    # per-batch-row partials


def weighted_mse_loss(predictions, targets, game_lengths, *, block_b=None,
                      vmem_budget_bytes=16 << 20):
    """predictions: [B, P, S] float, targets: [B, S] float, game_lengths: [B] int -> scalar f32."""
    B, P, S = predictions.shape
    PS = P * S

    # Free, contiguous reshape: lane-dense blocks, no (P,S)->(8,128) sublane padding in VMEM.
    pred2d = predictions.reshape(B, PS)

    # Clamp lengths to [1, S]: guards 1/0, and is exactly equivalent to the torch semantics
    # for L > S (the 1/L factor cancels between numerator and denominator after truncation).
    gl2d = jnp.clip(game_lengths.astype(jnp.int32), 1, S).reshape(B, 1)

    if block_b is None:
        block_b = _choose_block_b(B, PS, S, predictions.dtype, targets.dtype, vmem_budget_bytes)
    else:
        block_b = int(min(block_b, B))
        if block_b != B:                    # (8,128) rule: rows must be x8 or the full dim
            block_b = B if B < 8 else max(8, (block_b // 8) * 8)

    nb = -(-B // block_b)   # ceil-div; ragged tail handled by Pallas partial-tile masking

    # Explicit scoped-VMEM limit from the PADDED, double-buffered footprint
    # (v5e scoped default is only 16 MiB; v6e/v7x 32 MiB; v7x physical VMEM is 64 MiB).
    footprint = 2 * (_block_vmem_bytes(block_b, PS, predictions.dtype)
                     + _block_vmem_bytes(block_b, S, targets.dtype)
                     + _block_vmem_bytes(block_b, 1, jnp.int32)
                     + _block_vmem_bytes(block_b, 1, jnp.float32))
    vmem_limit = int(min(max(footprint + (4 << 20), 16 << 20), 48 << 20))

    bytes_accessed = (B * PS * jnp.dtype(predictions.dtype).itemsize
                      + B * S * jnp.dtype(targets.dtype).itemsize
                      + B * 4 + B * 4)
    cost = pl.CostEstimate(flops=4 * B * PS + 6 * B * S,
                           transcendentals=0,
                           bytes_accessed=bytes_accessed)

    # TODO(synk): for very large P*S (block footprint too big even at block_b=8), add an inner
    # "arbitrary" lane-tile grid axis with a VMEM accumulator instead of full-row blocks.
    grid_spec = pltpu.PrefetchScalarGridSpec(
        num_scalar_prefetch=0,
        grid=(nb,),
        in_specs=[
            pl.BlockSpec((block_b, 1), lambda i: (i, 0)),     # clamped game lengths
            pl.BlockSpec((block_b, PS), lambda i: (i, 0)),    # flattened predictions tile
            pl.BlockSpec((block_b, S), lambda i: (i, 0)),     # targets tile
        ],
        out_specs=pl.BlockSpec((block_b, 1), lambda i: (i, 0)),  # per-row partials
    )

    partials = pl.pallas_call(
        _wmse_kernel,
        out_shape=jax.ShapeDtypeStruct((B, 1), jnp.float32),
        grid_spec=grid_spec,
        compiler_params=pltpu.CompilerParams(
            dimension_semantics=("parallel",),      # independent per-row partials -> megacore
            vmem_limit_bytes=vmem_limit),
        cost_estimate=cost,
    )(gl2d, pred2d, targets)

    # Tiny final reduction (B floats) kept outside the kernel.
    return jnp.sum(partials)


def _reference_loss(pred, tgt, gl):
    """Plain-JAX reference mirroring the PyTorch forward (f32 accumulation)."""
    B, P, S = pred.shape
    pos = jnp.arange(S)[None, :]
    glc = jnp.clip(gl.astype(jnp.int32), 1, S)
    lf = glc[:, None].astype(jnp.float32)
    w = jnp.where(pos < glc[:, None], (pos + 1).astype(jnp.float32) / lf, 0.0)      # (B, S)
    sq = (pred.astype(jnp.float32) - tgt.astype(jnp.float32)[:, None, :]) ** 2      # (B, P, S)
    num = jnp.sum(sq * w[:, None, :], axis=2)                                       # (B, P)
    den = jnp.sum(w, axis=1, keepdims=True)                                         # (B, 1)
    return jnp.sum(num / den)


if __name__ == "__main__":
    key = jax.random.PRNGKey(0)
    kp, kt, kp2, kt2, kl2 = jax.random.split(key, 5)

    # Case 1: small shapes matching the module's forward:
    #   predictions [batch=2, length(P)=4, seq_len=16], targets [2,16], per-game lengths.
    B, P, S = 2, 4, 16
    predictions = jax.random.normal(kp, (B, P, S), dtype=jnp.float32)
    targets = jax.random.normal(kt, (B, S), dtype=jnp.float32)
    game_lengths = jnp.array([10, 16], dtype=jnp.int32)   # each in [1, S], <= max_moves

    loss = jax.block_until_ready(weighted_mse_loss(predictions, targets, game_lengths))
    ref = jax.block_until_ready(_reference_loss(predictions, targets, game_lengths))
    assert jnp.allclose(loss, ref, rtol=1e-5, atol=1e-5), (loss, ref)

    # Case 2: bf16 inputs, batch not divisible by the block (ragged tail, multi-step grid).
    B2, P2, S2 = 20, 4, 24
    pred2 = jax.random.normal(kp2, (B2, P2, S2), dtype=jnp.float32).astype(jnp.bfloat16)
    tgt2 = jax.random.normal(kt2, (B2, S2), dtype=jnp.float32).astype(jnp.bfloat16)
    gl2 = jax.random.randint(kl2, (B2,), 1, S2 + 1).astype(jnp.int32)

    loss2 = jax.block_until_ready(weighted_mse_loss(pred2, tgt2, gl2, block_b=8))
    ref2 = jax.block_until_ready(_reference_loss(pred2, tgt2, gl2))
    assert jnp.allclose(loss2, ref2, rtol=1e-3, atol=1e-3), (loss2, ref2)

    print("KERNEL_OK")
</pallas_src>

<mosaic_0001>
module attributes {stable_mosaic.version = 11 : i64} {
  func.func @_wmse_kernel(%arg0: i32, %arg1: memref<2x1xi32, #tpu.memory_space<vmem>>, %arg2: memref<2x64xf32, #tpu.memory_space<vmem>>, %arg3: memref<2x16xf32, #tpu.memory_space<vmem>>, %arg4: memref<2x1xf32, #tpu.memory_space<vmem>>) attributes {dimension_semantics = [#tpu.dimension_semantics<parallel>], iteration_bounds = array<i64: 1>, scalar_prefetch = 0 : i64, scratch_operands = 0 : i64, tpu.core_type = #tpu.core_type<tc>, window_params = [{transform_indices = @transform_0, window_bounds = array<i64: 2, 1>}, {transform_indices = @transform_1, window_bounds = array<i64: 2, 64>}, {transform_indices = @transform_2, window_bounds = array<i64: 2, 16>}, {transform_indices = @transform_3, window_bounds = array<i64: 2, 1>}]} {
    %c0 = arith.constant 0 : index
    %c0_0 = arith.constant 0 : index
    %0 = vector.load %arg1[%c0, %c0_0] : memref<2x1xi32, #tpu.memory_space<vmem>>, vector<2x1xi32>
    %1 = arith.sitofp %0 : vector<2x1xi32> to vector<2x1xf32>
    %2 = tpu.iota {dimensions = array<i32: 1>} : vector<1x16xi32>
    %3 = tpu.reciprocal %1 : vector<2x1xf32> -> vector<2x1xf32>
    %4 = vector.broadcast %2 : vector<1x16xi32> to vector<2x16xi32>
    %5 = vector.broadcast %0 : vector<2x1xi32> to vector<2x16xi32>
    %6 = arith.cmpi slt, %4, %5 : vector<2x16xi32>
    %c1_i32 = arith.constant 1 : i32
    %7 = vector.broadcast %c1_i32 : i32 to vector<1x16xi32>
    %8 = arith.addi %2, %7 : vector<1x16xi32>
    %9 = arith.sitofp %8 : vector<1x16xi32> to vector<1x16xf32>
    %10 = vector.broadcast %9 : vector<1x16xf32> to vector<2x16xf32>
    %11 = vector.broadcast %3 : vector<2x1xf32> to vector<2x16xf32>
    %12 = arith.mulf %10, %11 : vector<2x16xf32>
    %cst = arith.constant 0.000000e+00 : f32
    %13 = vector.broadcast %cst : f32 to vector<2x16xf32>
    %14 = arith.select %6, %12, %13 : vector<2x16xi1>, vector<2x16xf32>
    %c0_1 = arith.constant 0 : index
    %c0_2 = arith.constant 0 : index
    %15 = vector.load %arg3[%c0_1, %c0_2] : memref<2x16xf32, #tpu.memory_space<vmem>>, vector<2x16xf32>
    %cst_3 = arith.constant 0.000000e+00 : f32
    %16 = vector.broadcast %cst_3 : f32 to vector<2x1xf32>
    %c0_4 = arith.constant 0 : index
    %c0_5 = arith.constant 0 : index
    %17 = vector.load %arg2[%c0_4, %c0_5] : memref<2x64xf32, #tpu.memory_space<vmem>>, vector<2x16xf32>
    %18 = arith.subf %17, %15 : vector<2x16xf32>
    %19 = arith.mulf %18, %18 : vector<2x16xf32>
    %20 = arith.mulf %19, %14 : vector<2x16xf32>
    %cst_6 = arith.constant dense<0.000000e+00> : vector<2xf32>
    %21 = vector.multi_reduction <add>, %20, %cst_6 [1] : vector<2x16xf32> to vector<2xf32>
    %22 = vector.shape_cast %21 : vector<2xf32> to vector<2x1xf32>
    %23 = arith.addf %16, %22 : vector<2x1xf32>
    %c0_7 = arith.constant 0 : index
    %c16 = arith.constant 16 : index
    %24 = vector.load %arg2[%c0_7, %c16] : memref<2x64xf32, #tpu.memory_space<vmem>>, vector<2x16xf32>
    %25 = arith.subf %24, %15 : vector<2x16xf32>
    %26 = arith.mulf %25, %25 : vector<2x16xf32>
    %27 = arith.mulf %26, %14 : vector<2x16xf32>
    %cst_8 = arith.constant dense<0.000000e+00> : vector<2xf32>
    %28 = vector.multi_reduction <add>, %27, %cst_8 [1] : vector<2x16xf32> to vector<2xf32>
    %29 = vector.shape_cast %28 : vector<2xf32> to vector<2x1xf32>
    %30 = arith.addf %23, %29 : vector<2x1xf32>
    %c0_9 = arith.constant 0 : index
    %c32 = arith.constant 32 : index
    %31 = vector.load %arg2[%c0_9, %c32] : memref<2x64xf32, #tpu.memory_space<vmem>>, vector<2x16xf32>
    %32 = arith.subf %31, %15 : vector<2x16xf32>
    %33 = arith.mulf %32, %32 : vector<2x16xf32>
    %34 = arith.mulf %33, %14 : vector<2x16xf32>
    %cst_10 = arith.constant dense<0.000000e+00> : vector<2xf32>
    %35 = vector.multi_reduction <add>, %34, %cst_10 [1] : vector<2x16xf32> to vector<2xf32>
    %36 = vector.shape_cast %35 : vector<2xf32> to vector<2x1xf32>
    %37 = arith.addf %30, %36 : vector<2x1xf32>
    %c0_11 = arith.constant 0 : index
    %c48 = arith.constant 48 : index
    %38 = vector.load %arg2[%c0_11, %c48] : memref<2x64xf32, #tpu.memory_space<vmem>>, vector<2x16xf32>
    %39 = arith.subf %38, %15 : vector<2x16xf32>
    %40 = arith.mulf %39, %39 : vector<2x16xf32>
    %41 = arith.mulf %40, %14 : vector<2x16xf32>
    %cst_12 = arith.constant dense<0.000000e+00> : vector<2xf32>
    %42 = vector.multi_reduction <add>, %41, %cst_12 [1] : vector<2x16xf32> to vector<2xf32>
    %43 = vector.shape_cast %42 : vector<2xf32> to vector<2x1xf32>
    %44 = arith.addf %37, %43 : vector<2x1xf32>
    %cst_13 = arith.constant 1.000000e+00 : f32
    %45 = vector.broadcast %cst_13 : f32 to vector<2x1xf32>
    %46 = arith.addf %1, %45 : vector<2x1xf32>
    %47 = tpu.reciprocal %46 : vector<2x1xf32> -> vector<2x1xf32>
    %cst_14 = arith.constant 2.000000e+00 : f32
    %48 = vector.broadcast %cst_14 : f32 to vector<2x1xf32>
    %49 = arith.mulf %48, %47 : vector<2x1xf32>
    %50 = arith.mulf %44, %49 : vector<2x1xf32>
    %c0_15 = arith.constant 0 : index
    %c0_16 = arith.constant 0 : index
    %51 = vector.load %arg4[%c0_15, %c0_16] : memref<2x1xf32, #tpu.memory_space<vmem>>, vector<2x1xf32>
    tpu.vector_store %arg4[%c0_15, %c0_16], %50 {strides = array<i32>} : memref<2x1xf32, #tpu.memory_space<vmem>>, vector<2x1xf32>,
    return
  }
  func.func @transform_0(%arg0: i32) -> (i32, i32) {
    %c0_i32 = arith.constant 0 : i32
    %c0_i32_0 = arith.constant 0 : i32
    return %arg0, %c0_i32 : i32, i32
  }
  func.func @transform_1(%arg0: i32) -> (i32, i32) {
    %c0_i32 = arith.constant 0 : i32
    %c0_i32_0 = arith.constant 0 : i32
    return %arg0, %c0_i32 : i32, i32
  }
  func.func @transform_2(%arg0: i32) -> (i32, i32) {
    %c0_i32 = arith.constant 0 : i32
    %c0_i32_0 = arith.constant 0 : i32
    return %arg0, %c0_i32 : i32, i32
  }
  func.func @transform_3(%arg0: i32) -> (i32, i32) {
    %c0_i32 = arith.constant 0 : i32
    %c0_i32_0 = arith.constant 0 : i32
    return %arg0, %c0_i32 : i32, i32
  }
}

</mosaic_0001>

<bundles_post_ra>
// kernel: tpu_custom_call.1
= control target key start
LH: loop header
LB: loop body
LE: loop exit
PB: predicated region body
PF: predicated region fallthrough
CT: control target
= control target key end

     0   :  { %v143_v0 = vmov 0   ;;  %s144_s16 = smov 16   ;;  %s145_s17 = smov 32   ;;  %v16_v14 = vlaneseq  ;;  %vm50_vm5 = vcmask 123904   ;;  %vm125_vm10 = vcmask 1024   ;;  %s192_s0 = inlined_call_operand.vmem [shape: s32[2,1], index: 0, kind: input, shape index: {}]   ;;  %s193_s2 = inlined_call_operand.vmem [shape: f32[2,16], index: 2, kind: input, shape index: {}]   ;;  %s194_s1 = inlined_call_operand.vmem [shape: f32[2,64], index: 1, kind: input, shape index: {}]   ;;  %s195_s3 = inlined_call_operand.vmem [shape: f32[2,1], index: 3, kind: output, shape index: {}]  }
   0x1   :  { %138 = vset.pattern.permute.xlu0 %v143_v0  ;;  %v14_v1 = vld [vmem:[%s192_s0] sm:$0x3]  ;;  %s146_s0 = smov 48   ;;  %s147_s19 = smov 112  }
   0x2   :  { %v45_v2 = vld [vmem:[%s193_s2] sm:$0x3]  ;;  %v176_v3 = vcvt.s32.f32 %v14_v1  ;;  %v17_v15 = vand.u32 127, %v16_v14  ;;  %s148_s20 = smov 96   ;;  %s149_s21 = smov 80  }
   0x3   :  { %56 = vrot.lane.b32.xlu1 %v45_v2, %s144_s16  ;;  %v46_v23 = vld [vmem:[%s194_s1] sm:$0x3] }
   0x4   :  { %139 = vrcp.f32 %v176_v3  ;;  %v29_v6 = vand.u32 2147483648, %v176_v3  ;;  %vm23_vm0 = vweird.f32 %v176_v3  ;;  %v27_v8 = vand.u32 2147483647, %v176_v3 }
   0x5   :  { %v36_v16 = vadd.s32 1, %v17_v15  ;;  %v47_v38 = vsub.f32 %v46_v23, %v45_v2  ;;  %v108_v48 = vadd.f32 1.0, %v176_v3 }
   0x6   :  { %v30_v10 = vor.u32 1.1754944e-38, %v29_v6  ;;  %vm28_vm3 = vcmp.eq.f32.partialorder %v27_v8, 8.507059e+37 }
   0x7   :  { %v37_v18 = vcvt.s32.f32 %v36_v16  ;;  %v48_v39 = vmul.f32 %v47_v38, %v47_v38  ;;  %141 = vrcp.f32 %v108_v48  ;;  %vm114_vm6 = vweird.f32 %v108_v48 }
   0x8   :  { %v120_v53 = vand.u32 2147483648, %v108_v48  ;;  %v118_v55 = vand.u32 2147483647, %v108_v48 }
   0xa   :  { %v140_v4 = vpop.eup %139  ;;  %v121_v57 = vor.u32 1.1754944e-38, %v120_v53  ;;  %vm119_vm9 = vcmp.eq.f32.partialorder %v118_v55, 8.507059e+37 }
   0xb   :  { %74 = vrot.lane.b32.xlu1 %v45_v2, %s145_s17  ;;  %v19_v5 = vmul.f32 %v140_v4, %v176_v3  ;;  %vm24_vm1 = vweird.f32 %v140_v4 }
   0xc   :  { %vm25_vm2 = vmor %vm23_vm0, %vm24_vm1 }
   0xd   :  { %v20_v7 = vsub.f32 1.0, %v19_v5  ;;  %v142_v49 = vpop.eup %141 }
   0xe   :  { %v110_v50 = vmul.f32 %v142_v49, %v108_v48  ;;  %vm115_vm7 = vweird.f32 %v142_v49 }
   0xf   :  { %v21_v9 = vmul.f32 %v140_v4, %v20_v7  ;;  %vm116_vm8 = vmor %vm114_vm6, %vm115_vm7 }
  0x10   :  { %v111_v51 = vsub.f32 1.0, %v110_v50 }
  0x11   :  { %v22_v11 = vadd.f32 %v140_v4, %v21_v9 }
  0x12   :  { %v112_v52 = vmul.f32 %v142_v49, %v111_v51 }
  0x13   :  { %v26_v12 = vsel %vm25_vm2, %v140_v4, %v22_v11 }
  0x14   :  { %v31_v13 = vsel %vm28_vm3, %v30_v10, %v26_v12  ;;  %v113_v54 = vadd.f32 %v142_v49, %v112_v52 }
  0x15   :  { %40 = vperm.xlu0 %138, %v31_v13  }
  0x16   :  { %v117_v58 = vsel %vm116_vm8, %v142_v49, %v113_v54 }
  0x17   :  { %v122_v60 = vsel %vm119_vm9, %v121_v57, %v117_v58 }
  0x18   :  { %v123_v0 = vmul.f32 2.0, %v122_v60 }
  0x1d   :  { %33 = vperm.xlu0 %138, %v14_v1  }
  0x75   :  { %v57_v22 = vpop.permute.xlu1 %56 }
  0x76   :  { %v59_v24 = vsub.f32 %v46_v23, %v57_v22 }
  0x78   :  { %v60_v25 = vmul.f32 %v59_v24, %v59_v24 }
  0x7d   :  { %v75_v28 = vpop.permute.xlu1 %74 }
  0x7e   :  { %v77_v31 = vsub.f32 %v46_v23, %v75_v28 }
  0x80   :  { %v78_v33 = vmul.f32 %v77_v31, %v77_v31 }
  0x87   :  { %v41_v17 = vpop.permute.xlu0 %40 }
  0x88   :  { %v43_v19 = vmul.f32 %v41_v17, %v37_v18 }
  0x8f   :  { %v34_v20 = vpop.permute.xlu0 %33 }
  0x90   :  { %vm35_vm4 = vcmp.lt.s32.totalorder %v17_v15, %v34_v20 }
  0x91   :  { %v44_v21 = vsel %vm35_vm4, %v43_v19, 0.0 }
  0x92   :  { %96 = vrot.lane.b32.xlu1 %v44_v21, %s146_s0  ;;  %79 = vrot.lane.b32.xlu0 %v44_v21, %s145_s17  ;;  %v49_v40 = vmul.f32 %v48_v39, %v44_v21 }
  0x93   :  { %62 = vrot.lane.b32.xlu2 %v44_v21, %s144_s16 }
  0x94   :  { %v51_v41 = vsel %vm50_vm5, %v49_v40, 0.0 }
  0x9b   :  { %91 = vrot.lane.b32.xlu2 %v45_v2, %s146_s0 }
  0xed   :  { %v63_v26 = vpop.permute.xlu2 %62 }
  0xee   :  { %v65_v27 = vmul.f32 %v63_v26, %v60_v25 }
  0xf0   :  { %67 = vrot.lane.b32.xlu2 %v65_v27, %s147_s19 }
  0xf5   :  { %v92_v29 = vpop.permute.xlu2 %91 }
  0xf6   :  { %v94_v30 = vsub.f32 %v46_v23, %v92_v29 }
  0xf8   :  { %v95_v32 = vmul.f32 %v94_v30, %v94_v30 }
 0x104   :  { %v97_v34 = vpop.permute.xlu1 %96  ;;  %v80_v35 = vpop.permute.xlu0 %79 }
 0x105   :  { %v99_v36 = vmul.f32 %v97_v34, %v95_v32  ;;  %v82_v37 = vmul.f32 %v80_v35, %v78_v33 }
 0x107   :  { %84 = vrot.lane.b32.xlu0 %v82_v37, %s148_s20  ;;  %101 = vrot.lane.b32.xlu1 %v99_v36, %s149_s21 }
 0x119   :  { %52 = vadd.xlane.f32.xlu2 %v51_v41 }
 0x14a   :  { %v68_v42 = vpop.permute.xlu2 %67 }
 0x14b   :  { %v70_v43 = vsel %vm50_vm5, %v68_v42, 0.0 }
 0x14c   :  { %71 = vadd.xlane.f32.xlu0 %v70_v43 }
 0x179   :  { %v85_v44 = vpop.permute.xlu0 %84  ;;  %v102_v45 = vpop.permute.xlu1 %101 }
 0x17a   :  { %v87_v46 = vsel %vm50_vm5, %v85_v44, 0.0  ;;  %v104_v47 = vsel %vm50_vm5, %v102_v45, 0.0 }
 0x17b   :  { %88 = vadd.xlane.f32.xlu1 %v87_v46  ;;  %105 = vadd.xlane.f32.xlu2 %v104_v47 }
 0x18c   :  { %v53_v56 = vpop.xlane.xlu2 %52 }
 0x1bf   :  { %v72_v59 = vpop.xlane.xlu0 %71 }
 0x1c0   :  { %v73_v61 = vadd.f32 %v72_v59, %v53_v56 }
 0x1ee   :  { %v89_v62 = vpop.xlane.xlu1 %88  ;;  %v106_v1 = vpop.xlane.xlu2 %105 }
 0x1ef   :  { %v90_v63 = vadd.f32 %v89_v62, %v73_v61 }
 0x1f1   :  { %v107_v2 = vadd.f32 %v106_v1, %v90_v63 }
 0x1f3   :  { %v124_v3 = vmul.f32 %v123_v0, %v107_v2 }
 0x1f5   :  { %126 = vst.msk [vmem:[%s195_s3] sm:$0x3] %vm125_vm10, %v124_v3 }

</bundles_post_ra>
